<compile_context>
chip_gen: v7x
topology: tpu7x:2x2x1
jax: 0.10.0
libtpu: 0.0.40
codegen_flags: <defaults>
</compile_context>

<pallas_src>
import functools
import math

import jax
import jax.numpy as jnp
from jax.experimental import pallas as pl
from jax.experimental.pallas import tpu as pltpu


# --------------------------------------------------------------------------
# Kernels
# --------------------------------------------------------------------------
def _precise_recip(denom):
    # EUP approximate reciprocal (separate bundle slot, ~free) + 2 Newton
    # refinements on the tiny per-row column -> full f32 accuracy.
    inv = pl.reciprocal(denom, approx=True)
    inv = inv * (2.0 - denom * inv)
    inv = inv * (2.0 - denom * inv)
    return inv


def _ln_rowwise_kernel(x_ref, g_ref, b_ref, o_ref, *, eps, d_model):
    """One row per normalization group; last dim of the block == d_model."""
    x = x_ref[...].astype(jnp.float32)                   # (T, D)
    gamma = g_ref[...].astype(jnp.float32)               # (1, D)
    beta = b_ref[...].astype(jnp.float32)                # (1, D)

    ddof = max(d_model - 1, 1)
    mean = jnp.sum(x, axis=-1, keepdims=True) * (1.0 / d_model)    # (T, 1)
    diff = x - mean
    var = jnp.sum(diff * diff, axis=-1, keepdims=True) * (1.0 / ddof)
    denom = jnp.sqrt(var) + eps
    inv = _precise_recip(denom)                           # (T, 1)
    o_ref[...] = (gamma * (diff * inv) + beta).astype(o_ref.dtype)


def _ln_packed_kernel(x_ref, g_ref, b_ref, gmat_ref, gmat_t_ref, o_ref,
                      *, eps, d_model):
    """k = lane_width // d_model rows packed per lane-dense super-row.

    Segmented mean/var over each d_model-wide lane group are computed with a
    tiny 0/1 group-membership matrix on the MXU, keeping all loads/stores and
    elementwise work lane-dense (multiple of 128 lanes, no masked vst.msk).
    """
    x = x_ref[...].astype(jnp.float32)                    # (T, k*D)
    gamma = g_ref[...].astype(jnp.float32)                # (1, k*D)  (gamma tiled k times)
    beta = b_ref[...].astype(jnp.float32)                 # (1, k*D)
    G = gmat_ref[...]                                     # (k*D, k)  f32 0/1
    GT = gmat_t_ref[...]                                  # (k, k*D)  f32 0/1

    ddof = max(d_model - 1, 1)
    s = jnp.dot(x, G, preferred_element_type=jnp.float32)             # (T, k) group sums
    mean = s * (1.0 / d_model)                                        # (T, k)
    mean_full = jnp.dot(mean, GT, preferred_element_type=jnp.float32)  # (T, k*D)
    diff = x - mean_full
    var = jnp.dot(diff * diff, G, preferred_element_type=jnp.float32) * (1.0 / ddof)
    denom = jnp.sqrt(var) + eps                                       # (T, k)
    inv = _precise_recip(denom)                                       # (T, k)
    inv_full = jnp.dot(inv, GT, preferred_element_type=jnp.float32)   # (T, k*D)
    o_ref[...] = (gamma * (diff * inv_full) + beta).astype(o_ref.dtype)


# --------------------------------------------------------------------------
# Wrapper
# --------------------------------------------------------------------------
_TARGET_BLOCK_BYTES = 4 * 1024 * 1024   # input block target; knee is ~1 MiB, >4 MiB buys <1-2%
_VMEM_BUDGET_BYTES = 28 * 1024 * 1024   # I/O (double-buffered) + f32 temps; safe on every generation
_VMEM_LIMIT_BYTES = 48 * 1024 * 1024    # scoped limit; below v7x's 64 MiB/TC physical VMEM


def _packing_factor(d_model, rows):
    """How many rows to fold into one lane-dense super-row (1 = no packing)."""
    if d_model % 128 == 0:
        return 1                                   # already lane-dense
    lane_width = (d_model * 128) // math.gcd(d_model, 128)    # lcm(d_model, 128)
    k = lane_width // d_model
    if k < 2 or lane_width > 512:
        return 1
    if rows <= 0 or rows % k != 0:
        # Falling back to the row-wise path is cheaper than materializing a
        # padded copy (the kernel is HBM-bound; a pad is a full extra R+W).
        return 1
    return k


def _choose_tile_rows(packed_rows, lane_width, itemsize, tile_rows=None):
    # Multiple of 16 for 2-byte I/O dtypes (bf16 sublane packing), else 8.
    min_tile = 16 if itemsize == 2 else 8
    if packed_rows <= min_tile:
        # Single full-extent block (full-dim block shapes are always legal).
        return max(packed_rows, 1)
    if tile_rows is None:
        # Per-row VMEM cost: double-buffered in + out blocks in the I/O dtype
        # (4 copies) plus ~4 f32-wide live temporaries inside the body.
        per_row = lane_width * (4 * itemsize + 4 * 4)
        t = _VMEM_BUDGET_BYTES // per_row
        t = min(t, _TARGET_BLOCK_BYTES // (lane_width * itemsize))
        t = max(min_tile, (t // min_tile) * min_tile)
    else:
        t = max(min_tile, (tile_rows // min_tile) * min_tile)
    # Keep the block within the array (partial last block handles the tail).
    return min(t, (packed_rows // min_tile) * min_tile)


def layer_norm(x, gamma, beta, eps=1e-12, tile_rows=None, dimension_semantics=None):
    """x: (..., d_model); gamma, beta: (d_model,)."""
    orig_shape = x.shape
    d_model = orig_shape[-1]
    rows = math.prod(orig_shape[:-1]) if len(orig_shape) > 1 else 1

    k = _packing_factor(d_model, rows)
    lane_width = k * d_model
    itemsize = jnp.dtype(x.dtype).itemsize
    packed_rows = rows // k                       # exact: k == 1 or rows % k == 0
    tile = _choose_tile_rows(packed_rows, lane_width, itemsize, tile_rows)

    # Free (metadata-only) reshape of the contiguous input; no pad, no copy.
    x2 = x.reshape(packed_rows, lane_width)
    gamma2 = jnp.tile(gamma.reshape(-1), k).reshape(1, lane_width)
    beta2 = jnp.tile(beta.reshape(-1), k).reshape(1, lane_width)

    grid = (pl.cdiv(packed_rows, tile),)          # partial last block masked by Pallas
    row_spec = pl.BlockSpec((tile, lane_width), lambda i: (i, 0))
    vec_spec = pl.BlockSpec((1, lane_width), lambda i: (0, 0))

    if dimension_semantics is None:
        # Rows are independent. On v7x pass (pltpu.CORE_PARALLEL,) to shard
        # this axis across both TensorCores; kept opt-in so a single-TC part
        # (v5e/v6e) compiles without question.
        dimension_semantics = ("parallel",)

    compiler_params = pltpu.CompilerParams(
        dimension_semantics=dimension_semantics,
        vmem_limit_bytes=_VMEM_LIMIT_BYTES,
    )

    if k == 1:
        kernel = functools.partial(_ln_rowwise_kernel, eps=eps, d_model=d_model)
        in_specs = [row_spec, vec_spec, vec_spec]
        args = (x2, gamma2, beta2)
    else:
        lane_idx = jnp.arange(lane_width, dtype=jnp.int32)
        grp_idx = jnp.arange(k, dtype=jnp.int32)
        G = (lane_idx[:, None] // d_model == grp_idx[None, :]).astype(jnp.float32)
        GT = G.T
        kernel = functools.partial(_ln_packed_kernel, eps=eps, d_model=d_model)
        in_specs = [
            row_spec, vec_spec, vec_spec,
            pl.BlockSpec((lane_width, k), lambda i: (0, 0)),
            pl.BlockSpec((k, lane_width), lambda i: (0, 0)),
        ]
        args = (x2, gamma2, beta2, G, GT)

    out2 = pl.pallas_call(
        kernel,
        out_shape=jax.ShapeDtypeStruct((packed_rows, lane_width), x.dtype),
        grid_spec=pltpu.PrefetchScalarGridSpec(
            num_scalar_prefetch=0,
            grid=grid,
            in_specs=in_specs,
            out_specs=row_spec,
        ),
        compiler_params=compiler_params,
    )(*args)

    return out2.reshape(orig_shape)               # free reshape, no slice


# --------------------------------------------------------------------------
# Pure-JAX reference (reproduces the PyTorch module exactly)
# --------------------------------------------------------------------------
def layer_norm_ref(x, gamma, beta, eps=1e-12):
    mean = jnp.mean(x, axis=-1, keepdims=True)
    d = x.shape[-1]
    var = jnp.sum((x - mean) ** 2, axis=-1, keepdims=True) / (d - 1)   # unbiased
    std = jnp.sqrt(var)
    return gamma * ((x - mean) / (std + eps)) + beta


if __name__ == "__main__":
    key = jax.random.PRNGKey(0)
    k0, k1, k2, k3, k4, k5, k6, k7 = jax.random.split(key, 8)

    # Case 1: module-sized (batch=2, seq=8, d_model=32 -> packed path, k=4),
    # default torch.ones/zeros parameters.
    batch, seq, d_model = 2, 8, 32
    x = jax.random.normal(k0, (batch, seq, d_model), dtype=jnp.float32)
    gamma = jnp.ones((d_model,), dtype=jnp.float32)
    beta = jnp.zeros((d_model,), dtype=jnp.float32)
    out = jax.block_until_ready(layer_norm(x, gamma, beta))
    ref = layer_norm_ref(x, gamma, beta)
    assert out.shape == x.shape and out.dtype == x.dtype
    assert jnp.allclose(out, ref, atol=1e-5, rtol=1e-5)

    # Case 2: large d_model, ragged row count (15 rows) -> row-wise path with a
    # Pallas-masked partial last block (no pad / slice copies).
    x2 = jax.random.normal(k1, (3, 5, 256), dtype=jnp.float32)
    g2 = jax.random.normal(k2, (256,), dtype=jnp.float32)
    b2 = jax.random.normal(k3, (256,), dtype=jnp.float32)
    o2 = jax.block_until_ready(layer_norm(x2, g2, b2))
    assert jnp.allclose(o2, layer_norm_ref(x2, g2, b2), atol=1e-5, rtol=1e-5)

    # Case 3: d_model=64 with odd row count (35 % 2 != 0) -> packing disabled,
    # narrow row-wise fallback (still no extra HBM round trips).
    x3 = jax.random.normal(k4, (5, 7, 64), dtype=jnp.float32)
    g3 = jax.random.normal(k5, (64,), dtype=jnp.float32)
    b3 = jax.random.normal(k6, (64,), dtype=jnp.float32)
    o3 = jax.block_until_ready(layer_norm(x3, g3, b3))
    assert jnp.allclose(o3, layer_norm_ref(x3, g3, b3), atol=1e-5, rtol=1e-5)

    # Case 4: d_model=96 (does not divide 128) -> generalized lcm packing,
    # lane_width=384, k=4 (24 rows % 4 == 0).
    x4 = jax.random.normal(k7, (4, 6, 96), dtype=jnp.float32)
    g4 = jnp.ones((96,), dtype=jnp.float32)
    b4 = jnp.zeros((96,), dtype=jnp.float32)
    o4 = jax.block_until_ready(layer_norm(x4, g4, b4))
    assert jnp.allclose(o4, layer_norm_ref(x4, g4, b4), atol=1e-5, rtol=1e-5)

    print("KERNEL_OK")
</pallas_src>

<mosaic_0001>
module attributes {stable_mosaic.version = 11 : i64} {
  func.func @_ln_packed_kernel(%arg0: i32, %arg1: memref<4x128xf32, #tpu.memory_space<vmem>>, %arg2: memref<1x128xf32, #tpu.memory_space<vmem>>, %arg3: memref<1x128xf32, #tpu.memory_space<vmem>>, %arg4: memref<128x4xf32, #tpu.memory_space<vmem>>, %arg5: memref<4x128xf32, #tpu.memory_space<vmem>>, %arg6: memref<4x128xf32, #tpu.memory_space<vmem>>) attributes {dimension_semantics = [#tpu.dimension_semantics<parallel>], iteration_bounds = array<i64: 1>, scalar_prefetch = 0 : i64, scratch_operands = 0 : i64, tpu.core_type = #tpu.core_type<tc>, window_params = [{transform_indices = @transform_0, window_bounds = array<i64: 4, 128>}, {pipeline_mode = #tpu.pipeline_mode<synchronous>, transform_indices = @transform_1, window_bounds = array<i64: 1, 128>}, {pipeline_mode = #tpu.pipeline_mode<synchronous>, transform_indices = @transform_2, window_bounds = array<i64: 1, 128>}, {pipeline_mode = #tpu.pipeline_mode<synchronous>, transform_indices = @transform_3, window_bounds = array<i64: 128, 4>}, {pipeline_mode = #tpu.pipeline_mode<synchronous>, transform_indices = @transform_4, window_bounds = array<i64: 4, 128>}, {transform_indices = @transform_5, window_bounds = array<i64: 4, 128>}]} {
    %c0 = arith.constant 0 : index
    %c0_0 = arith.constant 0 : index
    %0 = vector.load %arg1[%c0, %c0_0] : memref<4x128xf32, #tpu.memory_space<vmem>>, vector<4x128xf32>
    %c0_1 = arith.constant 0 : index
    %c0_2 = arith.constant 0 : index
    %1 = vector.load %arg2[%c0_1, %c0_2] : memref<1x128xf32, #tpu.memory_space<vmem>>, vector<1x128xf32>
    %c0_3 = arith.constant 0 : index
    %c0_4 = arith.constant 0 : index
    %2 = vector.load %arg3[%c0_3, %c0_4] : memref<1x128xf32, #tpu.memory_space<vmem>>, vector<1x128xf32>
    %c0_5 = arith.constant 0 : index
    %c0_6 = arith.constant 0 : index
    %3 = vector.load %arg4[%c0_5, %c0_6] : memref<128x4xf32, #tpu.memory_space<vmem>>, vector<128x4xf32>
    %c0_7 = arith.constant 0 : index
    %c0_8 = arith.constant 0 : index
    %4 = vector.load %arg5[%c0_7, %c0_8] : memref<4x128xf32, #tpu.memory_space<vmem>>, vector<4x128xf32>
    %cst = arith.constant dense<0.000000e+00> : vector<4x4xf32>
    %5 = tpu.matmul %0, %3, %cst {dimension_numbers = #tpu.dot_dimension_numbers<[1], [0], [0], [1], [0, 0, 1, 1], [], []>} : vector<4x128xf32>, vector<128x4xf32>, vector<4x4xf32> -> vector<4x4xf32>
    %cst_9 = arith.constant 3.125000e-02 : f32
    %6 = vector.broadcast %cst_9 : f32 to vector<4x4xf32>
    %7 = arith.mulf %5, %6 : vector<4x4xf32>
    %cst_10 = arith.constant dense<0.000000e+00> : vector<4x128xf32>
    %8 = tpu.matmul %7, %4, %cst_10 {dimension_numbers = #tpu.dot_dimension_numbers<[1], [0], [0], [1], [0, 0, 1, 1], [], []>} : vector<4x4xf32>, vector<4x128xf32>, vector<4x128xf32> -> vector<4x128xf32>
    %9 = arith.subf %0, %8 : vector<4x128xf32>
    %10 = arith.mulf %9, %9 : vector<4x128xf32>
    %cst_11 = arith.constant dense<0.000000e+00> : vector<4x4xf32>
    %11 = tpu.matmul %10, %3, %cst_11 {dimension_numbers = #tpu.dot_dimension_numbers<[1], [0], [0], [1], [0, 0, 1, 1], [], []>} : vector<4x128xf32>, vector<128x4xf32>, vector<4x4xf32> -> vector<4x4xf32>
    %cst_12 = arith.constant 0.0322580636 : f32
    %12 = vector.broadcast %cst_12 : f32 to vector<4x4xf32>
    %13 = arith.mulf %11, %12 : vector<4x4xf32>
    %14 = math.sqrt %13 : vector<4x4xf32>
    %cst_13 = arith.constant 9.99999996E-13 : f32
    %15 = vector.broadcast %cst_13 : f32 to vector<4x4xf32>
    %16 = arith.addf %14, %15 : vector<4x4xf32>
    %17 = tpu.reciprocal %16 {approx = true} : vector<4x4xf32> -> vector<4x4xf32>
    %18 = arith.mulf %16, %17 : vector<4x4xf32>
    %cst_14 = arith.constant 2.000000e+00 : f32
    %19 = vector.broadcast %cst_14 : f32 to vector<4x4xf32>
    %20 = arith.subf %19, %18 : vector<4x4xf32>
    %21 = arith.mulf %17, %20 : vector<4x4xf32>
    %22 = arith.mulf %16, %21 : vector<4x4xf32>
    %cst_15 = arith.constant 2.000000e+00 : f32
    %23 = vector.broadcast %cst_15 : f32 to vector<4x4xf32>
    %24 = arith.subf %23, %22 : vector<4x4xf32>
    %25 = arith.mulf %21, %24 : vector<4x4xf32>
    %cst_16 = arith.constant dense<0.000000e+00> : vector<4x128xf32>
    %26 = tpu.matmul %25, %4, %cst_16 {dimension_numbers = #tpu.dot_dimension_numbers<[1], [0], [0], [1], [0, 0, 1, 1], [], []>} : vector<4x4xf32>, vector<4x128xf32>, vector<4x128xf32> -> vector<4x128xf32>
    %27 = arith.mulf %9, %26 : vector<4x128xf32>
    %28 = vector.broadcast %1 : vector<1x128xf32> to vector<4x128xf32>
    %29 = arith.mulf %28, %27 : vector<4x128xf32>
    %30 = vector.broadcast %2 : vector<1x128xf32> to vector<4x128xf32>
    %31 = arith.addf %29, %30 : vector<4x128xf32>
    %c0_17 = arith.constant 0 : index
    %c0_18 = arith.constant 0 : index
    %32 = vector.load %arg6[%c0_17, %c0_18] : memref<4x128xf32, #tpu.memory_space<vmem>>, vector<4x128xf32>
    tpu.vector_store %arg6[%c0_17, %c0_18], %31 {strides = array<i32>} : memref<4x128xf32, #tpu.memory_space<vmem>>, vector<4x128xf32>,
    return
  }
  func.func @transform_0(%arg0: i32) -> (i32, i32) {
    %c0_i32 = arith.constant 0 : i32
    %c0_i32_0 = arith.constant 0 : i32
    return %arg0, %c0_i32 : i32, i32
  }
  func.func @transform_1(%arg0: i32) -> (i32, i32) {
    %c0_i32 = arith.constant 0 : i32
    %c0_i32_0 = arith.constant 0 : i32
    %c0_i32_1 = arith.constant 0 : i32
    return %c0_i32, %c0_i32_0 : i32, i32
  }
  func.func @transform_2(%arg0: i32) -> (i32, i32) {
    %c0_i32 = arith.constant 0 : i32
    %c0_i32_0 = arith.constant 0 : i32
    %c0_i32_1 = arith.constant 0 : i32
    return %c0_i32, %c0_i32_0 : i32, i32
  }
  func.func @transform_3(%arg0: i32) -> (i32, i32) {
    %c0_i32 = arith.constant 0 : i32
    %c0_i32_0 = arith.constant 0 : i32
    %c0_i32_1 = arith.constant 0 : i32
    return %c0_i32, %c0_i32_0 : i32, i32
  }
  func.func @transform_4(%arg0: i32) -> (i32, i32) {
    %c0_i32 = arith.constant 0 : i32
    %c0_i32_0 = arith.constant 0 : i32
    %c0_i32_1 = arith.constant 0 : i32
    return %c0_i32, %c0_i32_0 : i32, i32
  }
  func.func @transform_5(%arg0: i32) -> (i32, i32) {
    %c0_i32 = arith.constant 0 : i32
    %c0_i32_0 = arith.constant 0 : i32
    return %arg0, %c0_i32 : i32, i32
  }
}

</mosaic_0001>

<bundles_post_ra>
// kernel: tpu_custom_call.1
= control target key start
LH: loop header
LB: loop body
LE: loop exit
PB: predicated region body
PF: predicated region fallthrough
CT: control target
= control target key end

     0   :  { %v585_v3 = vmov 0.0|0.0   ;;  %vm586_vm0 = vmmov 0   ;;  %v587_v6 = vmov 0.0   ;;  %s713_s0 = inlined_call_operand.vmem [shape: f32[4,128], index: 0, kind: input, shape index: {}]   ;;  %s714_s1 = inlined_call_operand.vmem [shape: f32[1,128], index: 1, kind: input, shape index: {}]   ;;  %s715_s2 = inlined_call_operand.vmem [shape: f32[1,128], index: 2, kind: input, shape index: {}]   ;;  %s716_s3 = inlined_call_operand.vmem [shape: f32[128,4], index: 3, kind: input, shape index: {}]   ;;  %s717_s4 = inlined_call_operand.vmem [shape: f32[4,128], index: 4, kind: input, shape index: {}]   ;;  %s718_s5 = inlined_call_operand.hbm [shape: f32[4,128], index: 5, kind: output, shape index: {}]  }
   0x1   :  { %v24_v0 = vld [vmem:[%s716_s3] sm:$0xff]  ;;  %v25_v1 = vld [vmem:[%s716_s3 + $0x8] sm:$0xff]  ;;  %v26_v2 = vld [vmem:[%s716_s3 + $0x10] sm:$0xff]  ;;  %505 = vmatprep.subr.bf16.mxu0 %v585_v3  ;;  %457 = vmatprep.mubr.msk.f32.mxu0 %vm586_vm0, %v587_v6 }
   0x2   :  { %v506_v4 = vpack.c.bf16 %v25_v1, %v24_v0  ;;  %v27_v5 = vld [vmem:[%s716_s3 + $0x18] sm:$0xff]  ;;  %460 = vmatprep.subr.mxu1 %v587_v6  ;;  %462 = vmatprep.mubr.msk.f32.mxu1 %vm586_vm0, %v587_v6  ;;  %v28_v8 = vld [vmem:[%s716_s3 + $0x20] sm:$0xff]  ;;  %v29_v9 = vld [vmem:[%s716_s3 + $0x28] sm:$0xff] }
   0x3   :  { %v509_v7 = vpack.c.bf16 %v27_v5, %v26_v2 }
   0x4   :  { %507 = vmatpush3.bf16.msra.mxu0 %v506_v4 }
   0x5   :  { %508 = vmatprep.subr.bf16.mxu0 %v585_v3 }
   0x6   :  { %10 = vsyncpa [#allocation3], 0  ;;  %v512_v10 = vpack.c.bf16 %v29_v9, %v28_v8  ;;  %v30_v11 = vld [vmem:[%s716_s3 + $0x30] sm:$0xff]  ;;  %v31_v12 = vld [vmem:[%s716_s3 + $0x38] sm:$0xff]  ;;  %vm116_vm1 = vcmask 1043456   ;;  %vm112_vm2 = vcmask 31744  }
   0x7   :  { %v515_v13 = vpack.c.bf16 %v31_v12, %v30_v11  ;;  %v32_v14 = vld [vmem:[%s716_s3 + $0x40] sm:$0xff]  ;;  %v33_v15 = vld [vmem:[%s716_s3 + $0x48] sm:$0xff]  ;;  %v34_v17 = vld [vmem:[%s716_s3 + $0x50] sm:$0xff]  ;;  %s588_s30 = smov [#allocation2]  }
   0x8   :  { %510 = vmatpush3.bf16.msra.mxu0 %v509_v7  ;;  %v518_v16 = vpack.c.bf16 %v33_v15, %v32_v14  ;;  %v35_v18 = vld [vmem:[%s716_s3 + $0x58] sm:$0xff]  ;;  %v36_v20 = vld [vmem:[%s716_s3 + $0x60] sm:$0xff]  ;;  %v37_v21 = vld [vmem:[%s716_s3 + $0x68] sm:$0xff]  ;;  %s373_s6 = sshll.u32 %s588_s30, 4  ;;  %s374_s6 = int_to_ptr.vmem [resolvable:$true] %s373_s6 }
   0x9   :  { %511 = vmatprep.subr.bf16.mxu0 %v585_v3  ;;  %v521_v19 = vpack.c.bf16 %v35_v18, %v34_v17  ;;  %v524_v22 = vpack.c.bf16 %v37_v21, %v36_v20  ;;  %v38_v23 = vld [vmem:[%s716_s3 + $0x70] sm:$0xff]  ;;  %v39_v24 = vld [vmem:[%s716_s3 + $0x78] sm:$0xff]  ;;  %v21_v26 = vld [vmem:[%s713_s0] sm:$0xf]  ;;  %s561_s7 = scalar_lea.vmem %s374_s6, 64  ;;  %p566_p1 = scmp.lt.s32.totalorder %s374_s6, %s374_s6 }
   0xa   :  { %v527_v25 = vpack.c.bf16 %v39_v24, %v38_v23  ;;  %v40_v27 = vld [vmem:[%s717_s4] sm:$0xf]  ;;  %p562_p0 = scmp.ne.s32.totalorder %s374_s6, %s561_s7  ;;  %p567_p2 = scmp.lt.s32.totalorder %s561_s7, %s561_s7 }
   0xb   :  { %461 = vmatpush3.msk.msra.mxu1 %vm116_vm1, %v40_v27  ;;  %v385_v51 = vld [vmem:[%s714_s1] ss:$0 sm:$0xff] }
   0xc   :  { %513 = vmatpush3.bf16.msra.mxu0 %v512_v10  ;;  %529 = vmatprep.subr.bf16.mxu1 %v585_v3  ;;  %v386_v55 = vld [vmem:[%s715_s2] ss:$0 sm:$0xff]  ;;  %p568_p3 = por %p567_p2, %p566_p1 }
   0xd   :  { %514 = vmatprep.subr.bf16.mxu0 %v585_v3 }
   0xe   :  { %p569_p4 = pnand %p568_p3, %p562_p0 }
  0x10   :  { %516 = vmatpush3.bf16.msra.mxu0 %v515_v13 }
  0x11   :  { %517 = vmatprep.subr.bf16.mxu0 %v585_v3 }
  0x14   :  { %519 = vmatpush3.bf16.msra.mxu0 %v518_v16 }
  0x15   :  { %520 = vmatprep.subr.bf16.mxu0 %v585_v3 }
  0x18   :  { %522 = vmatpush3.bf16.msra.mxu0 %v521_v19 }
  0x19   :  { %523 = vmatprep.subr.bf16.mxu0 %v585_v3 }
  0x1c   :  { %525 = vmatpush3.bf16.msra.mxu0 %v524_v22 }
  0x1d   :  { %526 = vmatprep.subr.bf16.mxu0 %v585_v3 }
  0x20   :  { %528 = vmatpush3.bf16.msra.mxu0 %v527_v25 }
  0x21   :  { %500 = vmatprep.subr.mxu0 %v587_v6 }
  0x23   :  { %458 = vmatmul.mubr.f32.vlgmr.msra.gmra.mrb[0].mxu0 %v21_v26 }
  0x24   :  { %502 = vmatprep.mubr.msk.f32.mxu0 %vm586_vm0, %v587_v6  ;;  %501 = vmatpush3.msk.msra.mxu0 %vm116_vm1, %v40_v27 }
  0xf6   :  { %v107_v28 = vpop.f32.mrb[0].mxu0 }
  0xf7   :  { %v111_v29 = vmul.f32 0.03125, %v107_v28  ;;  %v459_v30 = vpop.f32.mrb[1].mxu0 }
  0xf9   :  { %463 = vmatmul.mubr.msk.f32.vlgmr.msra.gmra.mrb[0].mxu1 %vm112_vm2, %v111_v29 }
  0xfa   :  { %531 = vmatpush3.bf16.msra.mxu1 %v506_v4  ;;  %497 = vmatprep.mubr.msk.f32.mxu1 %vm586_vm0, %v587_v6 }
  0xfb   :  { %532 = vmatprep.subr.bf16.mxu1 %v585_v3 }
  0xfe   :  { %534 = vmatpush3.bf16.msra.mxu1 %v509_v7 }
  0xff   :  { %535 = vmatprep.subr.bf16.mxu1 %v585_v3 }
 0x102   :  { %537 = vmatpush3.bf16.msra.mxu1 %v512_v10 }
 0x103   :  { %538 = vmatprep.subr.bf16.mxu1 %v585_v3 }
 0x106   :  { %540 = vmatpush3.bf16.msra.mxu1 %v515_v13 }
 0x107   :  { %541 = vmatprep.subr.bf16.mxu1 %v585_v3 }
 0x10a   :  { %543 = vmatpush3.bf16.msra.mxu1 %v518_v16 }
 0x10b   :  { %544 = vmatprep.subr.bf16.mxu1 %v585_v3 }
 0x10e   :  { %546 = vmatpush3.bf16.msra.mxu1 %v521_v19 }
 0x10f   :  { %547 = vmatprep.subr.bf16.mxu1 %v585_v3 }
 0x112   :  { %549 = vmatpush3.bf16.msra.mxu1 %v524_v22 }
 0x113   :  { %550 = vmatprep.subr.bf16.mxu1 %v585_v3 }
 0x116   :  { %552 = vmatpush3.bf16.msra.mxu1 %v527_v25 }
 0x1cc   :  { %v186_v31 = vpop.f32.mrb[0].mxu1 }
 0x1cd   :  { %v190_v32 = vsub.f32 %v21_v26, %v186_v31  ;;  %v464_v33 = vpop.f32.mrb[1].mxu1 }
 0x1cf   :  { %v191_v34 = vmul.f32 %v190_v32, %v190_v32 }
 0x1d1   :  { %498 = vmatmul.mubr.f32.vlgmr.msra.gmra.mrb[2].mxu1 %v191_v34 }
 0x2a4   :  { %v258_v35 = vpop.f32.mrb[2].mxu1 }
 0x2a5   :  { %v262_v36 = vmul.f32 0.032258064, %v258_v35  ;;  %v499_v37 = vpop.f32.mrb[3].mxu1 }
 0x2a7   :  { %557 = vrsqrt.f32 %v262_v36  ;;  %vm265_vm3 = vcmp.eq.f32.partialorder %v262_v36, inf  ;;  %v268_v40 = vand.u32 2147483648, %v262_v36  ;;  %vm267_vm4 = vcmp.eq.f32.partialorder %v262_v36, 0.0 }
 0x2b1   :  { %v558_v38 = vpop.eup %557 }
 0x2b2   :  { %v264_v39 = vmul.f32 %v558_v38, %v262_v36 }
 0x2b4   :  { %v266_v41 = vsel %vm265_vm3, %v262_v36, %v264_v39 }
 0x2b5   :  { %v269_v42 = vsel %vm267_vm4, %v268_v40, %v266_v41 }
 0x2b6   :  { %v270_v43 = vadd.f32 1e-12, %v269_v42 }
 0x2b8   :  { %559 = vrcp.f32 %v270_v43 }
 0x2c2   :  { %v560_v44 = vpop.eup %559 }
 0x2c3   :  { %v272_v45 = vmul.f32 %v560_v44, %v270_v43 }
 0x2c5   :  { %v273_v46 = vsub.f32 2.0, %v272_v45 }
 0x2c7   :  { %v274_v47 = vmul.f32 %v560_v44, %v273_v46 }
 0x2c9   :  { %v275_v48 = vmul.f32 %v274_v47, %v270_v43 }
 0x2cb   :  { %v276_v49 = vsub.f32 2.0, %v275_v48 }
 0x2cd   :  { %v277_v50 = vmul.f32 %v276_v49, %v274_v47 }
 0x2cf   :  { %503 = vmatmul.mubr.msk.f32.vlgmr.msra.gmra.mrb[2].mxu0 %vm112_vm2, %v277_v50 }
 0x3a2   :  { %v347_v52 = vpop.f32.mrb[2].mxu0 }
 0x3a3   :  { %v351_v53 = vmul.f32 %v347_v52, %v190_v32  ;;  %v504_v54 = vpop.f32.mrb[3].mxu0 }
 0x3a5   :  { %v358_v56 = vmul.f32 %v385_v51, %v351_v53 }
 0x3a7   :  { %v365_v57 = vadd.f32 %v386_v55, %v358_v56 }
 0x3a9   :  { %366 = vst [vmem:[#allocation2] sm:$0xf] %v365_v57 }
 0x3aa   :  { %572 = shalt.err (!%p569_p4)
}
 0x3ab   :  { %s573_s9 = scalar_lea.hbm %s718_s5, 64 }
 0x3ac   :  { %p574_p5 = scmp.ne.s32.totalorder %s718_s5, %s573_s9  ;;  %p577_p6 = scmp.lt.u32.totalorder %s573_s9, %s718_s5 }
 0x3ae   :  { %p579_p7 = pnand %p577_p6, %p574_p5 }
 0x3b0   :  { %582 = shalt.err (!%p579_p7)
}
 0x3b1   :  { %376 = dma.vmem_to_hbm [thread:$0]  %s374_s6, 64, %s718_s5, [#allocation3]  }
 0x3b2   :  { %583 = dma.done.wait [#allocation3], 64  }
 0x3b3   :  { %584 = vsyncadd [#allocation3], 4294967232 }
 0x3b4   :  { %380 = vsyncpa [#allocation3], 1 }

</bundles_post_ra>
